<compile_context>
chip_gen: v6e
topology: v6e:2x2x1
jax: 0.10.0
libtpu: 0.0.40
codegen_flags: <defaults>
</compile_context>

<pallas_src>
import jax
import jax.numpy as jnp
from jax.experimental import pallas as pl
from jax.experimental.pallas import tpu as pltpu


def _round_up(x: int, m: int) -> int:
    return (x + m - 1) // m * m


def _patch_embed_kernel(patches_ref, w_ref, b_ref, out_ref):
    # patches_ref: [TM, Kp]  bf16
    # w_ref:       [Kp, Dp]  bf16 (resident across the M grid)
    # b_ref:       [1,  Dp]  f32  (resident)
    # out_ref:     [TM, Dp]  f32
    acc = jnp.dot(patches_ref[...], w_ref[...],
                  preferred_element_type=jnp.float32)
    out_ref[...] = (acc + b_ref[...]).astype(out_ref.dtype)


def patch_embed_pallas(patches, weight, bias, *, tm):
    """patches: [M_pad, Kp] bf16, weight: [Kp, Dp] bf16, bias: [1, Dp] f32.

    M_pad must be a multiple of `tm`; Kp, Dp multiples of 128 (lane-dense).
    Returns [M_pad, Dp] f32.
    """
    M, K = patches.shape
    _, D = weight.shape
    assert M % tm == 0 and K % 128 == 0 and D % 128 == 0

    grid_m = M // tm

    # VMEM budget: double-buffered patch + out tiles, resident weight/bias.
    vmem_needed = (2 * tm * K * 2       # patch tiles (bf16)
                   + 2 * tm * D * 4     # out tiles (f32)
                   + K * D * 2          # weight (bf16, resident)
                   + 2 * D * 4)         # bias (f32)
    vmem_limit = min(64 * 1024 * 1024,
                     max(2 * vmem_needed, 16 * 1024 * 1024))

    cost = pl.CostEstimate(
        flops=2 * M * K * D,
        transcendentals=0,
        bytes_accessed=(M * K * 2 + K * D * 2 + D * 4 + M * D * 4),
    )

    return pl.pallas_call(
        _patch_embed_kernel,
        out_shape=jax.ShapeDtypeStruct((M, D), jnp.float32),
        grid=(grid_m,),
        in_specs=[
            pl.BlockSpec((tm, K), lambda i: (i, 0)),   # streamed M tiles
            pl.BlockSpec((K, D), lambda i: (0, 0)),    # weight: resident
            pl.BlockSpec((1, D), lambda i: (0, 0)),    # bias: resident
        ],
        out_specs=pl.BlockSpec((tm, D), lambda i: (i, 0)),
        compiler_params=pltpu.CompilerParams(
            dimension_semantics=("parallel",),   # shards across TCs on v7x
            vmem_limit_bytes=vmem_limit,
        ),
        cost_estimate=cost,
    )(patches, weight, bias)


class VisionBackbonePallas:
    """Concrete (synthetic) VisionBackbone: ViT patch-embedding featurizer."""

    # Target rows per tile (modest enough to fit v5e's small scoped VMEM and
    # v7x's 64 MiB VMEM at real ViT K/D sizes while staying near HBM roofline).
    TM_TARGET = 512

    def __init__(self, vision_backbone_id: str, image_resize_strategy: str,
                 default_image_size: int = 16, *, in_channels: int = 4,
                 patch_size: int = 8, embed_dim_: int = 32,
                 key=None) -> None:
        self.identifier = vision_backbone_id
        self.image_resize_strategy = image_resize_strategy
        self.default_image_size = default_image_size
        self.in_channels = in_channels
        self.patch_size = patch_size
        self._embed_dim = embed_dim_

        if key is None:
            key = jax.random.PRNGKey(0)
        k_w, k_b = jax.random.split(key)
        # Conv2d(C, D, kernel=P, stride=P) weight: [D, C, P, P], bias: [D].
        C, P, D = in_channels, patch_size, embed_dim_
        K = C * P * P
        bound = 1.0 / (K ** 0.5)
        conv_w = jax.random.uniform(k_w, (D, C, P, P), jnp.float32, -bound, bound)
        conv_b = jax.random.uniform(k_b, (D,), jnp.float32, -bound, bound)

        # Matmul form (unpadded, f32) -- kept for reference / inspection.
        self.proj_w_f32 = conv_w.reshape(D, K).T            # [K, D]
        self.proj_b_f32 = conv_b.reshape(1, D)               # [1, D]

        # Kernel form: zero-pad K and D to multiples of 128 (lane-dense output,
        # full MXU width), cast operands to bf16, keep bias in f32.
        self._K = K
        self._Kp = _round_up(K, 128)
        self._Dp = _round_up(D, 128)
        w_pad = jnp.zeros((self._Kp, self._Dp), jnp.float32)
        w_pad = w_pad.at[:K, :D].set(self.proj_w_f32)
        b_pad = jnp.zeros((1, self._Dp), jnp.float32)
        b_pad = b_pad.at[:, :D].set(self.proj_b_f32)
        self.proj_w = w_pad.astype(jnp.bfloat16)             # [Kp, Dp] bf16
        self.proj_b = b_pad                                   # [1, Dp] f32

    # --- VisionBackbone "abstract" properties ---
    @property
    def default_image_resolution(self):
        return (self.in_channels, self.default_image_size, self.default_image_size)

    @property
    def embed_dim(self) -> int:
        return self._embed_dim

    @property
    def num_patches(self) -> int:
        return (self.default_image_size // self.patch_size) ** 2

    @property
    def half_precision_dtype(self):
        return jnp.bfloat16

    # TODO(synk): get_fsdp_wrapping_policy / get_image_transform are PyTorch
    # distributed / PIL-preprocessing concerns with no Pallas equivalent.

    def forward(self, pixel_values):
        """pixel_values: NCHW [B, C, H, W] -> patch features [B, N, D] (f32)."""
        B, C, H, W = pixel_values.shape
        P = self.patch_size
        Hp, Wp = H // P, W // P
        M, K, D = B * Hp * Wp, C * P * P, self._embed_dim

        # Patchify in bf16 (halves the extra HBM pass the transpose costs):
        # [B, C, Hp, P, Wp, P] -> [B, Hp, Wp, C, P, P] -> [M, K]
        px = pixel_values.astype(jnp.bfloat16)
        patches = px.reshape(B, C, Hp, P, Wp, P)
        patches = jnp.transpose(patches, (0, 2, 4, 1, 3, 5))
        patches = patches.reshape(M, K)

        # Pad K -> Kp (zero columns; matching weight rows are zero) and
        # M -> multiple of the tile size (extra rows discarded after).
        tm = min(self.TM_TARGET, _round_up(M, 16))   # bf16 sublane packing: 16
        M_pad = _round_up(M, tm)
        patches_p = jnp.zeros((M_pad, self._Kp), jnp.bfloat16)
        patches_p = patches_p.at[:M, :K].set(patches)

        out_p = patch_embed_pallas(patches_p, self.proj_w, self.proj_b, tm=tm)
        out = out_p[:M, :D]                            # drop M / D padding
        return out.reshape(B, Hp * Wp, D)

    __call__ = forward


if __name__ == "__main__":
    key = jax.random.PRNGKey(0)
    k_img, k_params = jax.random.split(key)

    B, C, H, W = 2, 4, 16, 16
    backbone = VisionBackbonePallas(
        "synthetic-vit-patch8", "resize-naive", default_image_size=H,
        in_channels=C, patch_size=8, embed_dim_=32, key=k_params,
    )

    pixel_values = jax.random.normal(k_img, (B, C, H, W), jnp.float32)

    feats = backbone(pixel_values)
    feats = jax.block_until_ready(feats)

    # Pure-JAX reference with the same numerics (bf16 operands, f32 accum).
    P = backbone.patch_size
    Hp, Wp = H // P, W // P
    ref_patches = jnp.transpose(
        pixel_values.astype(jnp.bfloat16).reshape(B, C, Hp, P, Wp, P),
        (0, 2, 4, 1, 3, 5),
    ).reshape(B * Hp * Wp, C * P * P)
    ref = (
        jnp.dot(ref_patches, backbone.proj_w_f32.astype(jnp.bfloat16),
                preferred_element_type=jnp.float32)
        + backbone.proj_b_f32
    ).reshape(B, Hp * Wp, -1)

    assert feats.shape == (B, backbone.num_patches, backbone.embed_dim)
    assert feats.dtype == jnp.float32
    assert jnp.allclose(feats, ref, atol=1e-3, rtol=1e-3)

    print("KERNEL_OK")
</pallas_src>

<mosaic_0001>
module attributes {stable_mosaic.version = 11 : i64} {
  func.func @_patch_embed_kernel(%arg0: i32, %arg1: memref<16x256xbf16, #tpu.memory_space<vmem>>, %arg2: memref<256x128xbf16, #tpu.memory_space<vmem>>, %arg3: memref<1x128xf32, #tpu.memory_space<vmem>>, %arg4: memref<16x128xf32, #tpu.memory_space<vmem>>) attributes {dimension_semantics = [#tpu.dimension_semantics<parallel>], iteration_bounds = array<i64: 1>, scalar_prefetch = 0 : i64, scratch_operands = 0 : i64, tpu.core_type = #tpu.core_type<tc>, window_params = [{transform_indices = @transform_0, window_bounds = array<i64: 16, 256>}, {pipeline_mode = #tpu.pipeline_mode<synchronous>, transform_indices = @transform_1, window_bounds = array<i64: 256, 128>}, {pipeline_mode = #tpu.pipeline_mode<synchronous>, transform_indices = @transform_2, window_bounds = array<i64: 1, 128>}, {transform_indices = @transform_3, window_bounds = array<i64: 16, 128>}]} {
    %c0 = arith.constant 0 : index
    %c0_0 = arith.constant 0 : index
    %0 = vector.load %arg1[%c0, %c0_0] : memref<16x256xbf16, #tpu.memory_space<vmem>>, vector<16x256xbf16>
    %c0_1 = arith.constant 0 : index
    %c0_2 = arith.constant 0 : index
    %1 = vector.load %arg2[%c0_1, %c0_2] : memref<256x128xbf16, #tpu.memory_space<vmem>>, vector<256x128xbf16>
    %cst = arith.constant dense<0.000000e+00> : vector<16x128xf32>
    %2 = tpu.matmul %0, %1, %cst {dimension_numbers = #tpu.dot_dimension_numbers<[1], [0], [0], [1], [0, 0, 1, 1], [], []>} : vector<16x256xbf16>, vector<256x128xbf16>, vector<16x128xf32> -> vector<16x128xf32>
    %c0_3 = arith.constant 0 : index
    %c0_4 = arith.constant 0 : index
    %3 = vector.load %arg3[%c0_3, %c0_4] : memref<1x128xf32, #tpu.memory_space<vmem>>, vector<1x128xf32>
    %4 = vector.broadcast %3 : vector<1x128xf32> to vector<16x128xf32>
    %5 = arith.addf %2, %4 : vector<16x128xf32>
    %c0_5 = arith.constant 0 : index
    %c0_6 = arith.constant 0 : index
    %6 = vector.load %arg4[%c0_5, %c0_6] : memref<16x128xf32, #tpu.memory_space<vmem>>, vector<16x128xf32>
    tpu.vector_store %arg4[%c0_5, %c0_6], %5 {strides = array<i32>} : memref<16x128xf32, #tpu.memory_space<vmem>>, vector<16x128xf32>,
    return
  }
  func.func @transform_0(%arg0: i32) -> (i32, i32) {
    %c0_i32 = arith.constant 0 : i32
    %c0_i32_0 = arith.constant 0 : i32
    return %arg0, %c0_i32 : i32, i32
  }
  func.func @transform_1(%arg0: i32) -> (i32, i32) {
    %c0_i32 = arith.constant 0 : i32
    %c0_i32_0 = arith.constant 0 : i32
    %c0_i32_1 = arith.constant 0 : i32
    return %c0_i32, %c0_i32_0 : i32, i32
  }
  func.func @transform_2(%arg0: i32) -> (i32, i32) {
    %c0_i32 = arith.constant 0 : i32
    %c0_i32_0 = arith.constant 0 : i32
    %c0_i32_1 = arith.constant 0 : i32
    return %c0_i32, %c0_i32_0 : i32, i32
  }
  func.func @transform_3(%arg0: i32) -> (i32, i32) {
    %c0_i32 = arith.constant 0 : i32
    %c0_i32_0 = arith.constant 0 : i32
    return %arg0, %c0_i32 : i32, i32
  }
}

</mosaic_0001>

<bundles_post_ra>
// kernel: tpu_custom_call.1
= control target key start
LH: loop header
LB: loop body
LE: loop exit
PB: predicated region body
PF: predicated region fallthrough
CT: control target
= control target key end

     0   :  { %8 = vsyncpa [#allocation3], 0  ;;  %s430_s0 = inlined_call_operand.hbm [shape: bf16[16,256], index: 0, kind: input, shape index: {}]   ;;  %s431_s1 = inlined_call_operand.hbm [shape: bf16[256,128], index: 1, kind: input, shape index: {}]   ;;  %s432_s2 = inlined_call_operand.vmem [shape: f32[1,128], index: 2, kind: input, shape index: {}]   ;;  %s433_s3 = inlined_call_operand.hbm [shape: f32[16,128], index: 3, kind: output, shape index: {}]  }
   0x1   :  { %9 = vsyncpa [#allocation6], 0 }
   0x2   :  { %10 = vsyncpa [#allocation4], 0  ;;  %s385_s12 = smov [#allocation2]  }
   0x3   :  { %s16_s13 = sshll.u32 %s385_s12, 4  ;;  %s17_s13 = int_to_ptr.vmem [resolvable:$true] %s16_s13 }
   0x4   :  { %s327_s14 = scalar_lea.vmem %s17_s13, 256  ;;  %p332_p1 = scmp.lt.s32.totalorder %s17_s13, %s17_s13 }
   0x5   :  { %p328_p0 = scmp.ne.s32.totalorder %s17_s13, %s327_s14  ;;  %p333_p2 = scmp.lt.s32.totalorder %s327_s14, %s327_s14 }
   0x7   :  { %p334_p3 = por %p333_p2, %p332_p1 }
   0x9   :  { %p335_p4 = pnand %p334_p3, %p328_p0 }
   0xb   :  { %338 = shalt.err (!%p335_p4)
}
   0xc   :  { %s386_s15 = smov 128   ;;  %s387_s16 = smov 8  }
   0xd   :  { %22 = dma.hbm_to_vmem [thread:$0]  %s430_s0, 256, %s17_s13, [#allocation3], %s386_s15, %s386_s15, %s387_s16  }
   0xe   :  { %s388_s19 = smov [#allocation5]  }
   0xf   :  { %s28_s20 = sshll.u32 %s388_s19, 4  ;;  %s29_s20 = int_to_ptr.vmem [resolvable:$true] %s28_s20 }
  0x10   :  { %s347_s21 = scalar_lea.vmem %s29_s20, 2048  ;;  %p352_p6 = scmp.lt.s32.totalorder %s29_s20, %s29_s20 }
  0x11   :  { %p348_p5 = scmp.ne.s32.totalorder %s29_s20, %s347_s21  ;;  %p353_p7 = scmp.lt.s32.totalorder %s347_s21, %s347_s21 }
  0x13   :  { %p354_p8 = por %p353_p7, %p352_p6 }
  0x15   :  { %p355_p9 = pnand %p354_p8, %p348_p5 }
  0x17   :  { %358 = shalt.err (!%p355_p9)
}
  0x18   :  { %s389_s22 = smov 64   ;;  %s390_s23 = smov 4  }
  0x19   :  { %34 = dma.hbm_to_vmem [thread:$0]  %s431_s1, 2048, %s29_s20, [#allocation6], %s389_s22, %s389_s22, %s390_s23  }
  0x1a   :  { %379 = dma.done.wait [#allocation3], 256  }
  0x1b   :  { %380 = vsyncadd [#allocation3], 4294967040 }
  0x1c   :  { %381 = dma.done.wait [#allocation6], 2048  }
  0x1d   :  { %382 = vsyncadd [#allocation6], 4294965248  ;;  %v300_v0 = vld [vmem:[#allocation5 + $0x78] sm:$0xff]   ;;  %v302_v2 = vld [vmem:[#allocation5 + $0x70] sm:$0xff]   ;;  %s391_s26 = smov [#allocation7]  }
  0x1e   :  { %v301_v1 = vld [vmem:[#allocation5 + $0x38] sm:$0xff]   ;;  %271 = vmatprep.subr.bf16.mxu0 %v300_v0  ;;  %v303_v3 = vld [vmem:[#allocation5 + $0x30] sm:$0xff]   ;;  %v304_v4 = vld [vmem:[#allocation5 + $0x68] sm:$0xff]   ;;  %s239_s27 = sshll.u32 %s391_s26, 4  ;;  %s240_s27 = int_to_ptr.vmem [resolvable:$true] %s239_s27 }
  0x1f   :  { %272 = vmatpush3.bf16.msra.mxu0 %v301_v1  ;;  %v305_v5 = vld [vmem:[#allocation5 + $0x28] sm:$0xff]   ;;  %v306_v6 = vld [vmem:[#allocation5 + $0x60] sm:$0xff]   ;;  %v308_v8 = vld [vmem:[#allocation5 + $0x58] sm:$0xff]   ;;  %s359_s28 = scalar_lea.vmem %s240_s27, 256  ;;  %p364_p11 = scmp.lt.s32.totalorder %s240_s27, %s240_s27 }
  0x20   :  { %273 = vmatprep.subr.bf16.mxu0 %v302_v2  ;;  %v307_v7 = vld [vmem:[#allocation5 + $0x20] sm:$0xff]   ;;  %v309_v9 = vld [vmem:[#allocation5 + $0x18] sm:$0xff]   ;;  %v310_v10 = vld [vmem:[#allocation5 + $0x50] sm:$0xff]   ;;  %p360_p10 = scmp.ne.s32.totalorder %s240_s27, %s359_s28  ;;  %p365_p12 = scmp.lt.s32.totalorder %s359_s28, %s359_s28 }
  0x21   :  { %v318_v11 = vld [vmem:[#allocation2 + $0x4] ss:$8 sps:$4 sm:$0xff]   ;;  %v312_v13 = vld [vmem:[#allocation5 + $0x48] sm:$0xff]   ;;  %v314_v15 = vld [vmem:[#allocation5 + $0x40] sm:$0xff]  }
  0x22   :  { %v311_v12 = vld [vmem:[#allocation5 + $0x10] sm:$0xff]   ;;  %223 = vmatprep.mubr.bf16.mxu0 %v318_v11  ;;  %v313_v14 = vld [vmem:[#allocation5 + $0x8] sm:$0xff]   ;;  %v315_v16 = vld [vmem:[#allocation5] sm:$0xff]   ;;  %p366_p13 = por %p365_p12, %p364_p11 }
  0x23   :  { %274 = vmatpush3.bf16.msra.mxu0 %v303_v3  ;;  %v316_v17 = vld [vmem:[#allocation2] ss:$8 sps:$4 sm:$0xff]  }
  0x24   :  { %275 = vmatprep.subr.bf16.mxu0 %v304_v4  ;;  %v252_v19 = vld [vmem:[%s432_s2] ss:$0 sm:$0xff]  ;;  %p367_p0 = pnand %p366_p13, %p360_p10 }
  0x27   :  { %276 = vmatpush3.bf16.msra.mxu0 %v305_v5 }
  0x28   :  { %277 = vmatprep.subr.bf16.mxu0 %v306_v6 }
  0x2b   :  { %278 = vmatpush3.bf16.msra.mxu0 %v307_v7 }
  0x2c   :  { %279 = vmatprep.subr.bf16.mxu0 %v308_v8 }
  0x2f   :  { %280 = vmatpush3.bf16.msra.mxu0 %v309_v9 }
  0x30   :  { %281 = vmatprep.subr.bf16.mxu0 %v310_v10 }
  0x33   :  { %282 = vmatpush3.bf16.msra.mxu0 %v311_v12 }
  0x34   :  { %283 = vmatprep.subr.bf16.mxu0 %v312_v13 }
  0x37   :  { %284 = vmatpush3.bf16.msra.mxu0 %v313_v14 }
  0x38   :  { %285 = vmatprep.subr.bf16.mxu0 %v314_v15 }
  0x3b   :  { %286 = vmatpush3.bf16.msra.mxu0 %v315_v16 }
  0x3e   :  { %224 = vmatmul.mubr.bf16.vlgmr.msra.gmra.mxu0 %v316_v17 }
  0xfe   :  { %v287_v18 = vpop.f32.mrf.mxu0 }
 0x100   :  { %v288_v20 = vpop.f32.mrf.mxu0 }
 0x101   :  { %v289_v21 = vadd.f32 %v288_v20, %v287_v18 }
 0x102   :  { %v290_v22 = vpop.f32.mrf.mxu0 }
 0x103   :  { %v226_v23 = vadd.f32 %v289_v21, %v252_v19 }
 0x104   :  { %v291_v24 = vpop.f32.mrf.mxu0 }
 0x105   :  { %232 = vst [vmem:[#allocation7] sm:$0xff] %v226_v23  ;;  %v292_v25 = vadd.f32 %v291_v24, %v290_v22 }
 0x107   :  { %v229_v26 = vadd.f32 %v292_v25, %v252_v19 }
 0x109   :  { %233 = vst [vmem:[#allocation7 + $0x8] sm:$0xff] %v229_v26 }
 0x10a   :  { %370 = shalt.err (!%p367_p0)
}
 0x10b   :  { %245 = dma.vmem_to_hbm [thread:$0]  %s240_s27, 256, %s433_s3, [#allocation4], %s386_s15, %s386_s15, %s387_s16  }
 0x10c   :  { %383 = dma.done.wait [#allocation4], 256  }
 0x10d   :  { %384 = vsyncadd [#allocation4], 4294967040 }
 0x10e   :  { %249 = vsyncpa [#allocation3], 1 }
 0x10f   :  { %250 = vsyncpa [#allocation6], 1 }
 0x110   :  { %251 = vsyncpa [#allocation4], 1 }

</bundles_post_ra>
